<compile_context>
chip_gen: v6e
topology: v6e:2x2x1
jax: 0.10.0
libtpu: 0.0.40
codegen_flags: <defaults>
</compile_context>

<pallas_src>
import jax
import jax.numpy as jnp
from jax.experimental import pallas as pl
from jax.experimental.pallas import tpu as pltpu

_LANE = 128     # vreg lane width
_SUBLANE = 8    # f32 sublane count


def _round_up(x, m):
    return (x + m - 1) // m * m


def _maybe_squeeze0(a):
    return a[0] if (a.ndim == 3 and a.shape[0] == 1) else a


def _vmem_capacity_bytes():
    try:
        return int(pltpu.get_tpu_info().vmem_capacity_bytes)
    except Exception:
        return 64 * 2**20   # conservative fallback (v7x per-core VMEM)


def _vmem_limit_bytes(needed_bytes):
    cap = _vmem_capacity_bytes()
    # 48 MiB cap on 64-MiB parts (v7x), up to ~96 MiB on 128-MiB parts (v5e/v6e).
    upper = max(48 << 20, int(cap * 3 // 4))
    return int(min(max(int(needed_bytes * 1.25), 32 << 20), upper))


# ---------------------------------------------------------------------------
# Single-step kernel: one (hidden-tile, batch-tile) grid step.
#
# Per-tile operands (VMEM):
#   x_ref  : (tb, Kp)       bf16  -- [inputs | hx] (zero-padded along K)
#   cx_ref : (tb, th)       f32
#   w_ref  : (Kp, 4*th)     bf16  -- fused [W_ih^T ; W_hh^T], gates [i|f|o|g]
#   b_ref  : (1, 4*th)      f32   -- bias_ih + bias_hh, same gate layout
# Outputs:
#   hy_ref, cy_ref : (tb, th)
# ---------------------------------------------------------------------------
def _lstm_cell_kernel(x_ref, cx_ref, w_ref, b_ref, hy_ref, cy_ref):
    th = hy_ref.shape[-1]

    # Single fused MXU matmul (K = input_size + hidden_size), f32 accumulate.
    gates = jnp.dot(x_ref[...], w_ref[...],
                    preferred_element_type=jnp.float32) + b_ref[...]

    # Gates are laid out [i | f | o | g]; th is a multiple of 128, so every
    # slice below is a whole-lane-tile slice and the sigmoids are one slab.
    sig = jax.nn.sigmoid(gates[:, : 3 * th])
    ingate = sig[:, 0 * th:1 * th]
    forget = sig[:, 1 * th:2 * th]
    out = sig[:, 2 * th:3 * th]
    cell = jnp.tanh(gates[:, 3 * th:4 * th])

    cx = cx_ref[...].astype(jnp.float32)
    cy = forget * cx + ingate * cell
    hy = out * jnp.tanh(cy)

    cy_ref[...] = cy.astype(cy_ref.dtype)
    hy_ref[...] = hy.astype(hy_ref.dtype)


# ---------------------------------------------------------------------------
# One-time (hoisted) parameter preparation for the single-step kernel.
# ---------------------------------------------------------------------------
def prepare_lstm_params(weight_ih, weight_hh, bias_ih, bias_hh, *,
                        compute_dtype=jnp.bfloat16, block_h=None):
    """Pre-fuse / transpose / pad / cast the LSTMCell parameters once.

    Produces:
      w : (n_h, Kp, 4*block_h) compute_dtype -- fused [W_ih^T ; W_hh^T],
          hidden axis tiled, gates of each tile adjacent on lanes [i|f|o|g].
      b : (n_h, 1, 4*block_h)  f32           -- bias_ih + bias_hh, same layout.
    """
    G, I = weight_ih.shape
    H = G // 4
    K = I + H

    Hp = _round_up(max(H, _LANE), _LANE)
    Kp = _round_up(K, 16)                       # packing-friendly contraction dim
    wsz = jnp.dtype(compute_dtype).itemsize

    if block_h is None:
        cap = _vmem_capacity_bytes()
        budget = cap // 3                       # weight double-buffer budget
        # On small-VMEM (2-TC) parts prefer >= 2 hidden tiles so megacore can
        # shard the hidden axis (weight stream 1x per chip, split across cores).
        max_bh = Hp if cap > (80 << 20) else (Hp // 2 if Hp >= 2 * _LANE else Hp)
        block_h = _LANE
        for cand in (512, 256, 128):
            if (cand <= max_bh and Hp % cand == 0
                    and 2 * Kp * 4 * cand * wsz <= budget):
                block_h = cand
                break
    assert Hp % block_h == 0 and block_h % _LANE == 0
    n_h = Hp // block_h

    perm = jnp.array([0, 1, 3, 2])              # [i, f, g, o] -> [i, f, o, g]

    # Per-gate fused transposed weights: (4, K, H) = [W_ih^T ; W_hh^T] per gate.
    w = jnp.concatenate([weight_ih.reshape(4, H, I),
                         weight_hh.reshape(4, H, H)], axis=2)[perm]   # (4, H, K)
    w = jnp.transpose(w, (0, 2, 1))                                   # (4, K, H)
    w = jnp.pad(w, ((0, 0), (0, Kp - K), (0, Hp - H)))                # (4, Kp, Hp)
    # Tile the hidden axis; keep the 4 gates of each tile adjacent on lanes.
    w = w.reshape(4, Kp, n_h, block_h)
    w = jnp.transpose(w, (2, 1, 0, 3)).reshape(n_h, Kp, 4 * block_h)
    w = w.astype(compute_dtype)

    b = (bias_ih + bias_hh).astype(jnp.float32).reshape(4, H)[perm]
    b = jnp.pad(b, ((0, 0), (0, Hp - H)))
    b = b.reshape(4, n_h, block_h)
    b = jnp.transpose(b, (1, 0, 2)).reshape(n_h, 1, 4 * block_h)

    return dict(w=w, b=b, input_size=I, hidden_size=H, hidden_padded=Hp,
                k_padded=Kp, block_h=block_h, compute_dtype=compute_dtype)


# ---------------------------------------------------------------------------
# Single-step forward (mirrors LSTMCell.forward): returns (hy, (hy, cy)).
# ---------------------------------------------------------------------------
def lstm_cell_pallas(inputs, hidden, params, *, block_b=None):
    hx = _maybe_squeeze0(hidden[0])   # (B, H)
    cx = _maybe_squeeze0(hidden[1])   # (B, H)

    B, I = inputs.shape
    H = params["hidden_size"]
    Hp = params["hidden_padded"]
    Kp = params["k_padded"]
    th = params["block_h"]
    cdt = params["compute_dtype"]
    n_h = Hp // th
    out_dtype = inputs.dtype

    # bf16 LHS blocks want a (16, 128) minimum tile -> batch tile multiple of 16.
    # (On v6e/v7x with B >= 256 and VMEM headroom, block_b=256 fills the 256x256
    #  MXU; keep 128 on v5e.)
    tb = block_b if block_b is not None else min(_round_up(B, 16), 128)
    tb = _round_up(tb, 16)
    Bp = _round_up(B, tb)
    n_b = Bp // tb

    # Cast to the MXU dtype *before* concat/pad (half the wrapper-side traffic).
    # Zero K-columns multiply zero weight rows -> no effect on the result.
    xh = jnp.concatenate([inputs.astype(cdt), hx.astype(cdt)], axis=1)   # (B, K)
    xh = jnp.pad(xh, ((0, Bp - B), (0, Kp - (I + H))))                   # (Bp, Kp)
    cx_p = jnp.pad(cx.astype(jnp.float32), ((0, Bp - B), (0, Hp - H)))

    w, b = params["w"], params["b"]
    cdt_sz = jnp.dtype(cdt).itemsize
    out_sz = jnp.dtype(out_dtype).itemsize

    # True double-buffered per-tile footprint + f32 compute headroom.
    needed = (2 * (tb * Kp * cdt_sz            # xh tile
                   + tb * th * 4               # cx tile
                   + Kp * 4 * th * cdt_sz      # weight tile
                   + 4 * th * 4)               # bias tile
              + 2 * 2 * tb * th * out_sz       # hy / cy tiles
              + 3 * tb * 4 * th * 4)           # f32 gates + intermediates
    vmem_limit = _vmem_limit_bytes(needed)

    # Hidden tiles on the outer (slow) axis so the weight tile stays
    # VMEM-resident across the inner batch loop.  With n_h >= 2, shard the
    # hidden axis across TensorCores (weights streamed once per chip).
    grid = (n_h, n_b)
    dim_sem = ("parallel", "arbitrary") if n_h >= 2 else ("arbitrary", "parallel")

    cost = pl.CostEstimate(
        flops=2 * Bp * Kp * 4 * Hp,
        transcendentals=5 * Bp * Hp,
        bytes_accessed=int(xh.size * cdt_sz + cx_p.size * 4
                           + w.size * cdt_sz + b.size * 4
                           + 2 * Bp * Hp * out_sz))

    hy_p, cy_p = pl.pallas_call(
        _lstm_cell_kernel,
        out_shape=(jax.ShapeDtypeStruct((Bp, Hp), out_dtype),
                   jax.ShapeDtypeStruct((Bp, Hp), out_dtype)),
        grid_spec=pltpu.PrefetchScalarGridSpec(
            num_scalar_prefetch=0,
            grid=grid,
            in_specs=[
                pl.BlockSpec((tb, Kp), lambda hi, bi: (bi, 0)),
                pl.BlockSpec((tb, th), lambda hi, bi: (bi, hi)),
                pl.BlockSpec((pl.Squeezed(), Kp, 4 * th),
                             lambda hi, bi: (hi, 0, 0)),
                pl.BlockSpec((pl.Squeezed(), 1, 4 * th),
                             lambda hi, bi: (hi, 0, 0)),
            ],
            out_specs=[pl.BlockSpec((tb, th), lambda hi, bi: (bi, hi)),
                       pl.BlockSpec((tb, th), lambda hi, bi: (bi, hi))],
        ),
        compiler_params=pltpu.CompilerParams(
            dimension_semantics=dim_sem,
            vmem_limit_bytes=vmem_limit),
        cost_estimate=cost,
    )(xh, cx_p, w, b)

    hy = hy_p[:B, :H]
    cy = cy_p[:B, :H]
    return hy, (hy, cy)


# ---------------------------------------------------------------------------
# Sequence kernel: grid=(T,), weights VMEM-resident for the whole sequence,
# hy/cy carried across timesteps in VMEM scratch.
# ---------------------------------------------------------------------------
def _lstm_seq_kernel(x_ref, h0_ref, c0_ref, wih_ref, whh_ref, b_ref,
                     hseq_ref, cy_ref, h_scr, c_scr):
    t = pl.program_id(0)
    Hp = cy_ref.shape[-1]

    @pl.when(t == 0)
    def _():
        h_scr[...] = h0_ref[...]
        c_scr[...] = c0_ref[...]

    gates = (jnp.dot(x_ref[...], wih_ref[...],
                     preferred_element_type=jnp.float32)
             + jnp.dot(h_scr[...].astype(whh_ref.dtype), whh_ref[...],
                       preferred_element_type=jnp.float32)
             + b_ref[...])

    sig = jax.nn.sigmoid(gates[:, : 3 * Hp])
    ingate = sig[:, 0 * Hp:1 * Hp]
    forget = sig[:, 1 * Hp:2 * Hp]
    out = sig[:, 2 * Hp:3 * Hp]
    cell = jnp.tanh(gates[:, 3 * Hp:4 * Hp])

    cy = forget * c_scr[...] + ingate * cell
    hy = out * jnp.tanh(cy)

    h_scr[...] = hy
    c_scr[...] = cy
    hseq_ref[0] = hy.astype(hseq_ref.dtype)
    cy_ref[...] = cy.astype(cy_ref.dtype)


def prepare_lstm_seq_params(weight_ih, weight_hh, bias_ih, bias_hh, *,
                            compute_dtype=jnp.bfloat16):
    """Weights for the fused-sequence kernel (single hidden tile)."""
    G, I = weight_ih.shape
    H = G // 4
    Hp = _round_up(max(H, _LANE), _LANE)
    Ip = _round_up(I, 16)
    perm = jnp.array([0, 1, 3, 2])            # [i, f, g, o] -> [i, f, o, g]

    wih = jnp.transpose(weight_ih.reshape(4, H, I)[perm], (2, 0, 1))   # (I, 4, H)
    wih = jnp.pad(wih, ((0, Ip - I), (0, 0), (0, Hp - H)))
    wih = wih.reshape(Ip, 4 * Hp).astype(compute_dtype)

    whh = jnp.transpose(weight_hh.reshape(4, H, H)[perm], (2, 0, 1))   # (H, 4, H)
    whh = jnp.pad(whh, ((0, Hp - H), (0, 0), (0, Hp - H)))
    whh = whh.reshape(Hp, 4 * Hp).astype(compute_dtype)

    b = (bias_ih + bias_hh).astype(jnp.float32).reshape(4, H)[perm]
    b = jnp.pad(b, ((0, 0), (0, Hp - H))).reshape(1, 4 * Hp)

    return dict(wih=wih, whh=whh, b=b, input_size=I, hidden_size=H,
                input_padded=Ip, hidden_padded=Hp, compute_dtype=compute_dtype)


def lstm_sequence_pallas(x_seq, hidden, seq_params):
    """Run T LSTMCell steps in one kernel (weights DMA'd from HBM once).

    x_seq: (T, B, I).  Returns (h_seq[T, B, H], (hy, cy)).
    """
    hx = _maybe_squeeze0(hidden[0]).astype(jnp.float32)
    cx = _maybe_squeeze0(hidden[1]).astype(jnp.float32)

    T, B, I = x_seq.shape
    H = seq_params["hidden_size"]
    Hp = seq_params["hidden_padded"]
    Ip = seq_params["input_padded"]
    cdt = seq_params["compute_dtype"]
    out_dtype = x_seq.dtype
    cdt_sz = jnp.dtype(cdt).itemsize
    out_sz = jnp.dtype(out_dtype).itemsize

    Bp = _round_up(B, 16)
    x_p = jnp.pad(x_seq.astype(cdt), ((0, 0), (0, Bp - B), (0, Ip - I)))
    h0_p = jnp.pad(hx, ((0, Bp - B), (0, Hp - H)))
    c0_p = jnp.pad(cx, ((0, Bp - B), (0, Hp - H)))

    wih, whh, b = seq_params["wih"], seq_params["whh"], seq_params["b"]

    needed = (2 * (Bp * Ip * cdt_sz + 2 * Bp * Hp * 4
                   + wih.size * cdt_sz + whh.size * cdt_sz + b.size * 4)
              + 2 * (Bp * Hp * out_sz * 2)
              + 2 * Bp * Hp * 4                     # h/c scratch
              + 3 * Bp * 4 * Hp * 4)                # f32 gates headroom
    vmem_limit = _vmem_limit_bytes(needed)

    hseq_p, cy_p = pl.pallas_call(
        _lstm_seq_kernel,
        out_shape=(jax.ShapeDtypeStruct((T, Bp, Hp), out_dtype),
                   jax.ShapeDtypeStruct((Bp, Hp), out_dtype)),
        grid_spec=pltpu.PrefetchScalarGridSpec(
            num_scalar_prefetch=0,
            grid=(T,),
            in_specs=[
                pl.BlockSpec((pl.Squeezed(), Bp, Ip), lambda t: (t, 0, 0)),
                pl.BlockSpec((Bp, Hp), lambda t: (0, 0)),
                pl.BlockSpec((Bp, Hp), lambda t: (0, 0)),
                pl.BlockSpec((Ip, 4 * Hp), lambda t: (0, 0)),
                pl.BlockSpec((Hp, 4 * Hp), lambda t: (0, 0)),
                pl.BlockSpec((1, 4 * Hp), lambda t: (0, 0)),
            ],
            out_specs=[pl.BlockSpec((1, Bp, Hp), lambda t: (t, 0, 0)),
                       pl.BlockSpec((Bp, Hp), lambda t: (0, 0))],
            scratch_shapes=[pltpu.VMEM((Bp, Hp), jnp.float32),
                            pltpu.VMEM((Bp, Hp), jnp.float32)],
        ),
        compiler_params=pltpu.CompilerParams(
            # The recurrence must run sequentially over T.
            dimension_semantics=("arbitrary",),
            vmem_limit_bytes=vmem_limit),
    )(x_p, h0_p, c0_p, wih, whh, b)

    h_seq = hseq_p[:, :B, :H]
    hy = h_seq[-1]
    cy = cy_p[:B, :H]
    return h_seq, (hy, cy)


# ---------------------------------------------------------------------------
# Pure-JAX references matching the PyTorch semantics.
# ---------------------------------------------------------------------------
def lstm_cell_ref(inputs, hidden, weight_ih, weight_hh, bias_ih, bias_hh,
                  compute_dtype=None):
    hx = _maybe_squeeze0(hidden[0])
    cx = _maybe_squeeze0(hidden[1])
    if compute_dtype is None:
        gates = inputs @ weight_ih.T + bias_ih + hx @ weight_hh.T + bias_hh
    else:
        gates = (jnp.dot(inputs.astype(compute_dtype),
                         weight_ih.T.astype(compute_dtype),
                         preferred_element_type=jnp.float32)
                 + bias_ih.astype(jnp.float32)
                 + jnp.dot(hx.astype(compute_dtype),
                           weight_hh.T.astype(compute_dtype),
                           preferred_element_type=jnp.float32)
                 + bias_hh.astype(jnp.float32))
    i, f, g, o = jnp.split(gates, 4, axis=1)
    i = jax.nn.sigmoid(i)
    f = jax.nn.sigmoid(f)
    g = jnp.tanh(g)
    o = jax.nn.sigmoid(o)
    cy = f * cx.astype(jnp.float32) + i * g
    hy = o * jnp.tanh(cy)
    return hy, (hy, cy)


def lstm_seq_ref(x_seq, hidden, weight_ih, weight_hh, bias_ih, bias_hh,
                 compute_dtype=None):
    h = _maybe_squeeze0(hidden[0]).astype(jnp.float32)
    c = _maybe_squeeze0(hidden[1]).astype(jnp.float32)
    hs = []
    for t in range(x_seq.shape[0]):
        h, (_, c) = lstm_cell_ref(x_seq[t], (h, c), weight_ih, weight_hh,
                                  bias_ih, bias_hh, compute_dtype=compute_dtype)
        hs.append(h)
    return jnp.stack(hs), (h, c)


if __name__ == "__main__":
    key = jax.random.PRNGKey(0)

    def make_weights(k, I, H):
        ks = jax.random.split(k, 4)
        return (jax.random.normal(ks[0], (4 * H, I), jnp.float32),
                jax.random.normal(ks[1], (4 * H, H), jnp.float32),
                jax.random.normal(ks[2], (4 * H,), jnp.float32),
                jax.random.normal(ks[3], (4 * H,), jnp.float32))

    def run_cell_case(B, I, H, block_b=None, block_h=None):
        k = jax.random.fold_in(key, 1000 * B + H)
        weight_ih, weight_hh, bias_ih, bias_hh = make_weights(k, I, H)
        ks = jax.random.split(jax.random.fold_in(k, 7), 3)
        x = jax.random.normal(ks[0], (B, I), jnp.float32)
        h0 = jax.random.normal(ks[1], (1, B, H), jnp.float32)
        c0 = jax.random.normal(ks[2], (1, B, H), jnp.float32)

        params = prepare_lstm_params(weight_ih, weight_hh, bias_ih, bias_hh,
                                     compute_dtype=jnp.bfloat16, block_h=block_h)
        hy, (hy2, cy) = lstm_cell_pallas(x, (h0, c0), params, block_b=block_b)
        jax.block_until_ready((hy, hy2, cy))

        hy_ref, (_, cy_ref) = lstm_cell_ref(
            x, (h0, c0), weight_ih, weight_hh, bias_ih, bias_hh,
            compute_dtype=jnp.bfloat16)
        assert hy.shape == (B, H) and cy.shape == (B, H)
        assert jnp.allclose(hy, hy_ref, atol=2e-2, rtol=2e-2), "hy mismatch"
        assert jnp.allclose(cy, cy_ref, atol=2e-2, rtol=2e-2), "cy mismatch"

    def run_seq_case(T, B, I, H):
        k = jax.random.fold_in(key, 77)
        weight_ih, weight_hh, bias_ih, bias_hh = make_weights(k, I, H)
        ks = jax.random.split(jax.random.fold_in(k, 9), 3)
        x_seq = jax.random.normal(ks[0], (T, B, I), jnp.float32)
        h0 = jax.random.normal(ks[1], (1, B, H), jnp.float32)
        c0 = jax.random.normal(ks[2], (1, B, H), jnp.float32)

        sp = prepare_lstm_seq_params(weight_ih, weight_hh, bias_ih, bias_hh,
                                     compute_dtype=jnp.bfloat16)
        h_seq, (hy, cy) = lstm_sequence_pallas(x_seq, (h0, c0), sp)
        jax.block_until_ready((h_seq, hy, cy))

        h_seq_ref, (hy_ref, cy_ref) = lstm_seq_ref(
            x_seq, (h0, c0), weight_ih, weight_hh, bias_ih, bias_hh,
            compute_dtype=jnp.bfloat16)
        assert h_seq.shape == (T, B, H)
        assert jnp.allclose(h_seq, h_seq_ref, atol=5e-2, rtol=5e-2), "h_seq mismatch"
        assert jnp.allclose(cy, cy_ref, atol=5e-2, rtol=5e-2), "cy mismatch"

    # Toy shape matching the module example (single grid tile).
    run_cell_case(B=8, I=16, H=32)
    # Larger shape exercising the (hidden-tile, batch-tile) grid (n_h = 2).
    run_cell_case(B=16, I=64, H=256, block_h=128)
    # Fused time-loop kernel: weights DMA'd once for the whole sequence.
    run_seq_case(T=8, B=8, I=16, H=32)

    print("KERNEL_OK")
</pallas_src>

<mosaic_0001>
module attributes {stable_mosaic.version = 11 : i64} {
  func.func @_lstm_cell_kernel(%arg0: i32, %arg1: i32, %arg2: memref<16x48xbf16, #tpu.memory_space<vmem>>, %arg3: memref<16x128xf32, #tpu.memory_space<vmem>>, %arg4: memref<1x48x512xbf16, #tpu.memory_space<vmem>>, %arg5: memref<1x1x512xf32, #tpu.memory_space<vmem>>, %arg6: memref<16x128xf32, #tpu.memory_space<vmem>>, %arg7: memref<16x128xf32, #tpu.memory_space<vmem>>) attributes {dimension_semantics = [#tpu.dimension_semantics<arbitrary>, #tpu.dimension_semantics<parallel>], iteration_bounds = array<i64: 1, 1>, scalar_prefetch = 0 : i64, scratch_operands = 0 : i64, tpu.core_type = #tpu.core_type<tc>, window_params = [{transform_indices = @transform_0, window_bounds = array<i64: 16, 48>}, {transform_indices = @transform_1, window_bounds = array<i64: 16, 128>}, {transform_indices = @transform_2, window_bounds = array<i64: 1, 48, 512>}, {transform_indices = @transform_3, window_bounds = array<i64: 1, 1, 512>}, {transform_indices = @transform_4, window_bounds = array<i64: 16, 128>}, {transform_indices = @transform_5, window_bounds = array<i64: 16, 128>}]} {
    %c0 = arith.constant 0 : index
    %c0_0 = arith.constant 0 : index
    %0 = vector.load %arg2[%c0, %c0_0] : memref<16x48xbf16, #tpu.memory_space<vmem>>, vector<16x48xbf16>
    %c0_1 = arith.constant 0 : index
    %c0_2 = arith.constant 0 : index
    %c0_3 = arith.constant 0 : index
    %1 = vector.load %arg4[%c0_1, %c0_2, %c0_3] : memref<1x48x512xbf16, #tpu.memory_space<vmem>>, vector<1x48x512xbf16>
    %2 = vector.shape_cast %1 : vector<1x48x512xbf16> to vector<48x512xbf16>
    %cst = arith.constant dense<0.000000e+00> : vector<16x512xf32>
    %3 = tpu.matmul %0, %2, %cst {dimension_numbers = #tpu.dot_dimension_numbers<[1], [0], [0], [1], [0, 0, 1, 1], [], []>} : vector<16x48xbf16>, vector<48x512xbf16>, vector<16x512xf32> -> vector<16x512xf32>
    %c0_4 = arith.constant 0 : index
    %c0_5 = arith.constant 0 : index
    %c0_6 = arith.constant 0 : index
    %4 = vector.load %arg5[%c0_4, %c0_5, %c0_6] : memref<1x1x512xf32, #tpu.memory_space<vmem>>, vector<1x1x512xf32>
    %5 = vector.shape_cast %4 : vector<1x1x512xf32> to vector<1x512xf32>
    %6 = vector.broadcast %5 : vector<1x512xf32> to vector<16x512xf32>
    %7 = arith.addf %3, %6 : vector<16x512xf32>
    %8 = vector.extract_strided_slice %7 {offsets = [0, 0], sizes = [16, 384], strides = [1, 1]} : vector<16x512xf32> to vector<16x384xf32>
    %9 = arith.negf %8 : vector<16x384xf32>
    %10 = math.exp %9 : vector<16x384xf32>
    %cst_7 = arith.constant 1.000000e+00 : f32
    %11 = vector.broadcast %cst_7 : f32 to vector<16x384xf32>
    %12 = arith.addf %11, %10 : vector<16x384xf32>
    %13 = arith.divf %11, %12 : vector<16x384xf32>
    %14 = vector.extract_strided_slice %13 {offsets = [0, 0], sizes = [16, 128], strides = [1, 1]} : vector<16x384xf32> to vector<16x128xf32>
    %15 = vector.extract_strided_slice %13 {offsets = [0, 128], sizes = [16, 128], strides = [1, 1]} : vector<16x384xf32> to vector<16x128xf32>
    %16 = vector.extract_strided_slice %13 {offsets = [0, 256], sizes = [16, 128], strides = [1, 1]} : vector<16x384xf32> to vector<16x128xf32>
    %17 = vector.extract_strided_slice %7 {offsets = [0, 384], sizes = [16, 128], strides = [1, 1]} : vector<16x512xf32> to vector<16x128xf32>
    %18 = math.tanh %17 : vector<16x128xf32>
    %c0_8 = arith.constant 0 : index
    %c0_9 = arith.constant 0 : index
    %19 = vector.load %arg3[%c0_8, %c0_9] : memref<16x128xf32, #tpu.memory_space<vmem>>, vector<16x128xf32>
    %20 = arith.mulf %15, %19 : vector<16x128xf32>
    %21 = arith.mulf %14, %18 : vector<16x128xf32>
    %22 = arith.addf %20, %21 : vector<16x128xf32>
    %23 = math.tanh %22 : vector<16x128xf32>
    %24 = arith.mulf %16, %23 : vector<16x128xf32>
    %c0_10 = arith.constant 0 : index
    %c0_11 = arith.constant 0 : index
    %25 = vector.load %arg7[%c0_10, %c0_11] : memref<16x128xf32, #tpu.memory_space<vmem>>, vector<16x128xf32>
    tpu.vector_store %arg7[%c0_10, %c0_11], %22 {strides = array<i32>} : memref<16x128xf32, #tpu.memory_space<vmem>>, vector<16x128xf32>,
    %c0_12 = arith.constant 0 : index
    %c0_13 = arith.constant 0 : index
    %26 = vector.load %arg6[%c0_12, %c0_13] : memref<16x128xf32, #tpu.memory_space<vmem>>, vector<16x128xf32>
    tpu.vector_store %arg6[%c0_12, %c0_13], %24 {strides = array<i32>} : memref<16x128xf32, #tpu.memory_space<vmem>>, vector<16x128xf32>,
    return
  }
  func.func @transform_0(%arg0: i32, %arg1: i32) -> (i32, i32) {
    %c0_i32 = arith.constant 0 : i32
    %c0_i32_0 = arith.constant 0 : i32
    return %arg1, %c0_i32 : i32, i32
  }
  func.func @transform_1(%arg0: i32, %arg1: i32) -> (i32, i32) {
    %c0_i32 = arith.constant 0 : i32
    return %arg1, %arg0 : i32, i32
  }
  func.func @transform_2(%arg0: i32, %arg1: i32) -> (i32, i32, i32) {
    %c0_i32 = arith.constant 0 : i32
    %c0_i32_0 = arith.constant 0 : i32
    %c0_i32_1 = arith.constant 0 : i32
    return %arg0, %c0_i32, %c0_i32_0 : i32, i32, i32
  }
  func.func @transform_3(%arg0: i32, %arg1: i32) -> (i32, i32, i32) {
    %c0_i32 = arith.constant 0 : i32
    %c0_i32_0 = arith.constant 0 : i32
    %c0_i32_1 = arith.constant 0 : i32
    return %arg0, %c0_i32, %c0_i32_0 : i32, i32, i32
  }
  func.func @transform_4(%arg0: i32, %arg1: i32) -> (i32, i32) {
    %c0_i32 = arith.constant 0 : i32
    return %arg1, %arg0 : i32, i32
  }
  func.func @transform_5(%arg0: i32, %arg1: i32) -> (i32, i32) {
    %c0_i32 = arith.constant 0 : i32
    return %arg1, %arg0 : i32, i32
  }
}

</mosaic_0001>

<bundles_post_ra>
// kernel: tpu_custom_call.1
= control target key start
LH: loop header
LB: loop body
LE: loop exit
PB: predicated region body
PF: predicated region fallthrough
CT: control target
= control target key end

     0   :  { %11 = vsyncpa [#allocation3], 0  ;;  %s603_s0 = inlined_call_operand.hbm [shape: bf16[16,48], index: 0, kind: input, shape index: {}]   ;;  %s604_s1 = inlined_call_operand.hbm [shape: f32[16,128], index: 1, kind: input, shape index: {}]   ;;  %s605_s2 = inlined_call_operand.hbm [shape: bf16[1,48,512], index: 2, kind: input, shape index: {}]   ;;  %s606_s3 = inlined_call_operand.vmem [shape: f32[1,1,512], index: 3, kind: input, shape index: {}]   ;;  %s607_s4 = inlined_call_operand.hbm [shape: f32[16,128], index: 4, kind: output, shape index: {0}]   ;;  %s608_s5 = inlined_call_operand.hbm [shape: f32[16,128], index: 5, kind: output, shape index: {1}]  }
   0x1   :  { %12 = vsyncpa [#allocation6], 0 }
   0x2   :  { %13 = vsyncpa [#allocation4], 0 }
   0x3   :  { %14 = vsyncpa [#allocation10], 0  ;;  %s534_s18 = smov [#allocation5]  }
   0x4   :  { %s32_s19 = sshll.u32 %s534_s18, 4  ;;  %s33_s19 = int_to_ptr.vmem [resolvable:$true] %s32_s19 }
   0x5   :  { %s434_s20 = scalar_lea.vmem %s33_s19, 256  ;;  %p439_p1 = scmp.lt.s32.totalorder %s33_s19, %s33_s19 }
   0x6   :  { %p435_p0 = scmp.ne.s32.totalorder %s33_s19, %s434_s20  ;;  %p440_p2 = scmp.lt.s32.totalorder %s434_s20, %s434_s20 }
   0x8   :  { %p441_p3 = por %p440_p2, %p439_p1 }
   0xa   :  { %p442_p4 = pnand %p441_p3, %p435_p0 }
   0xc   :  { %445 = shalt.err (!%p442_p4)
}
   0xd   :  { %s535_s21 = smov 128   ;;  %s536_s22 = smov 8  }
   0xe   :  { %38 = dma.hbm_to_vmem [thread:$0]  %s604_s1, 256, %s33_s19, [#allocation6], %s535_s21, %s535_s21, %s536_s22  }
   0xf   :  { %s537_s25 = smov [#allocation2]  }
  0x10   :  { %s20_s26 = sshll.u32 %s537_s25, 4  ;;  %s21_s26 = int_to_ptr.vmem [resolvable:$true] %s20_s26 }
  0x11   :  { %s454_s27 = scalar_lea.vmem %s21_s26, 128  ;;  %p459_p6 = scmp.lt.s32.totalorder %s21_s26, %s21_s26 }
  0x12   :  { %p455_p5 = scmp.ne.s32.totalorder %s21_s26, %s454_s27  ;;  %p460_p7 = scmp.lt.s32.totalorder %s454_s27, %s454_s27 }
  0x14   :  { %p461_p8 = por %p460_p7, %p459_p6 }
  0x16   :  { %p462_p9 = pnand %p461_p8, %p455_p5 }
  0x18   :  { %465 = shalt.err (!%p462_p9)
}
  0x19   :  { %s538_s28 = smov 64   ;;  %s539_s29 = smov 4  }
  0x1a   :  { %26 = dma.hbm_to_vmem [thread:$0]  %s603_s0, 128, %s21_s26, [#allocation3], %s538_s28, %s538_s28, %s539_s29  }
  0x1b   :  { %s540_s7 = smov [#allocation7]  }
  0x1c   :  { %s44_s8 = sshll.u32 %s540_s7, 4  ;;  %s45_s8 = int_to_ptr.vmem [resolvable:$true] %s44_s8 }
  0x1d   :  { %s474_s1 = scalar_lea.vmem %s45_s8, 1536  ;;  %p479_p11 = scmp.lt.s32.totalorder %s45_s8, %s45_s8 }
  0x1e   :  { %p475_p10 = scmp.ne.s32.totalorder %s45_s8, %s474_s1  ;;  %p480_p12 = scmp.lt.s32.totalorder %s474_s1, %s474_s1 }
  0x20   :  { %p481_p13 = por %p480_p12, %p479_p11 }
  0x22   :  { %p482_p0 = pnand %p481_p13, %p475_p10 }
  0x24   :  { %485 = shalt.err (!%p482_p0)
}
  0x25   :  { %s541_s9 = smov 256   ;;  %s542_s10 = smov 16  }
  0x26   :  { %50 = dma.hbm_to_vmem [thread:$0]  %s605_s2, 1536, %s45_s8, [#allocation6], %s541_s9, %s541_s9, %s542_s10  }
  0x27   :  { %526 = dma.done.wait [#allocation3], 128  }
  0x28   :  { %527 = vsyncadd [#allocation3], 4294967168 }
  0x29   :  { %528 = dma.done.wait [#allocation6], 1792  }
  0x2a   :  { %529 = vsyncadd [#allocation6], 4294965504  ;;  %v543_v0 = vmov 0   ;;  %v375_v1 = vld [vmem:[#allocation7 + $0x44] ss:$16 sps:$4 sm:$0xff]   ;;  %v384_v12 = vld [vmem:[#allocation2] sm:$0xff]   ;;  %v79_v14 = vlaneseq }
  0x2b   :  { %200 = vmatprep.mubr.bf16.mxu0 %v543_v0  ;;  %243 = vmatprep.mubr.bf16.mxu1 %v543_v0  ;;  %v377_v2 = vld [vmem:[#allocation7 + $0x40] ss:$16 sps:$4 sm:$0xff]   ;;  %v378_v3 = vld [vmem:[#allocation7 + $0x24] ss:$16 sps:$4 sm:$0xff]   ;;  %v385_v6 = vld [vmem:[#allocation7 + $0x4c] ss:$16 sps:$4 sm:$0xff]  }
  0x2c   :  { %178 = vmatprep.subr.bf16.mxu0 %v375_v1  ;;  %v380_v4 = vld [vmem:[#allocation7 + $0x20] ss:$16 sps:$4 sm:$0xff]   ;;  %v381_v5 = vld [vmem:[#allocation7 + $0x4] ss:$16 sps:$4 sm:$0xff]   ;;  %v387_v7 = vld [vmem:[#allocation7 + $0x48] ss:$16 sps:$4 sm:$0xff]   ;;  %221 = vmatprep.subr.bf16.mxu1 %v385_v6 }
  0x2d   :  { %179 = vmatpush1.bf16.msra.mxu0 %v377_v2  ;;  %v383_v8 = vld [vmem:[#allocation7] ss:$16 sps:$4 sm:$0xff]   ;;  %v388_v9 = vld [vmem:[#allocation7 + $0x2c] ss:$16 sps:$4 sm:$0xff]   ;;  %222 = vmatpush1.bf16.msra.mxu1 %v387_v7  ;;  %v390_v10 = vld [vmem:[#allocation7 + $0x28] ss:$16 sps:$4 sm:$0xff]  }
  0x2e   :  { %180 = vmatprep.subr.bf16.mxu0 %v378_v3  ;;  %223 = vmatprep.subr.bf16.mxu1 %v388_v9  ;;  %v391_v11 = vld [vmem:[#allocation7 + $0xc] ss:$16 sps:$4 sm:$0xff]   ;;  %vm164_vm0 = vcmask 392192   ;;  %v393_v13 = vld [vmem:[#allocation7 + $0x8] ss:$16 sps:$4 sm:$0xff]   ;;  %v80_v15 = vshrl.u32 %v79_v14, 7 }
  0x2f   :  { %v77_v17 = vld [vmem:[%s606_s3] sm:$0xf]  ;;  %v292_v58 = vld [vmem:[#allocation5] sm:$0xff]  ;;  %v293_v1 = vld [vmem:[#allocation5 + $0x8] sm:$0xff]  ;;  %s544_s3 = smov [#allocation9]  }
  0x30   :  { %v81_v16 = vsub.s32 0, %v80_v15  ;;  %v85_v18 = vsub.s32 1, %v80_v15  ;;  %v89_v26 = vsub.s32 2, %v80_v15  ;;  %v93_v35 = vsub.s32 3, %v80_v15  ;;  %s325_s13 = sshll.u32 %s544_s3, 4  ;;  %s326_s13 = int_to_ptr.vmem [resolvable:$true] %s325_s13 }
  0x31   :  { %181 = vmatpush1.bf16.msra.mxu0 %v380_v4  ;;  %224 = vmatpush1.bf16.msra.mxu1 %v390_v10  ;;  %s486_s14 = scalar_lea.vmem %s326_s13, 256  ;;  %p491_p2 = scmp.lt.s32.totalorder %s326_s13, %s326_s13 }
  0x32   :  { %182 = vmatprep.subr.bf16.mxu0 %v381_v5  ;;  %225 = vmatprep.subr.bf16.mxu1 %v391_v11  ;;  %v82_v19 = vrot.slane %v77_v17, %v81_v16  ;;  %v86_v20 = vrot.slane %v77_v17, %v85_v18  ;;  %v90_v33 = vrot.slane %v77_v17, %v89_v26  ;;  %p487_p1 = scmp.ne.s32.totalorder %s326_s13, %s486_s14  ;;  %p492_p3 = scmp.lt.s32.totalorder %s486_s14, %s486_s14 }
  0x33   :  { %v94_v39 = vrot.slane %v77_v17, %v93_v35 }
  0x34   :  { %p493_p4 = por %p492_p3, %p491_p2 }
  0x35   :  { %183 = vmatpush1.bf16.msra.mxu0 %v383_v8  ;;  %226 = vmatpush1.bf16.msra.mxu1 %v393_v13 }
  0x36   :  { %p494_p5 = pnand %p493_p4, %p487_p1 }
  0x38   :  { %355 = vmatmul.mubr.msk.bf16.vlgmr.msra.gmra.mxu0 %vm164_vm0, %v384_v12  ;;  %356 = vmatmul.mubr.msk.bf16.vlgmr.msra.gmra.mxu1 %vm164_vm0, %v384_v12 }
  0xf8   :  { %v202_v21 = vpop.f32.mrf.mxu0  ;;  %v245_v34 = vpop.f32.mrf.mxu1 }
  0xf9   :  { %v203_v22 = vadd.f32 %v202_v21, %v82_v19  ;;  %v246_v37 = vadd.f32 %v245_v34, %v90_v33 }
  0xfa   :  { %v204_v23 = vpop.f32.mrf.mxu0  ;;  %v247_v38 = vpop.f32.mrf.mxu1 }
  0xfb   :  { %v357_v24 = vmul.f32 -1.442695, %v203_v22  ;;  %v205_v25 = vadd.f32 %v204_v23, %v86_v20  ;;  %v359_v40 = vmul.f32 -1.442695, %v246_v37  ;;  %v248_v42 = vadd.f32 %v247_v38, %v94_v39 }
  0xfc   :  { %v206_v27 = vpop.f32.mrf.mxu0  ;;  %v249_v41 = vpop.f32.mrf.mxu1 }
  0xfd   :  { %394 = vpow2.f32 %v357_v24  ;;  %v358_v28 = vmul.f32 -1.442695, %v205_v25  ;;  %v207_v29 = vadd.f32 %v206_v27, %v82_v19  ;;  %v250_v43 = vadd.f32 %v249_v41, %v90_v33 }
  0xfe   :  { %v208_v30 = vpop.f32.mrf.mxu0  ;;  %v251_v46 = vpop.f32.mrf.mxu1 }
  0xff   :  { %396 = vpow2.f32 %v358_v28  ;;  %v360_v31 = vmul.f32 -1.442695, %v207_v29  ;;  %v209_v32 = vadd.f32 %v208_v30, %v86_v20  ;;  %v362_v48 = vmul.f32 -1.442695, %v250_v43 }
 0x100   :  { %v252_v51 = vadd.f32 %v251_v46, %v94_v39 }
 0x101   :  { %398 = vpow2.f32 %v360_v31  ;;  %v361_v36 = vmul.f32 -1.442695, %v209_v32 }
 0x103   :  { %400 = vpow2.f32 %v361_v36 }
 0x104   :  { %402 = vpow2.f32 %v359_v40 }
 0x105   :  { %404 = vtanh.f32 %v248_v42 }
 0x10a   :  { %v395_v44 = vpop.eup %394 }
 0x10b   :  { %v272_v45 = vadd.f32 1.0, %v395_v44 }
 0x10c   :  { %v397_v47 = vpop.eup %396 }
 0x10d   :  { %406 = vrcp.f32 %v272_v45  ;;  %v273_v49 = vadd.f32 1.0, %v397_v47 }
 0x10e   :  { %v399_v50 = vpop.eup %398 }
 0x10f   :  { %408 = vrcp.f32 %v273_v49  ;;  %v275_v52 = vadd.f32 1.0, %v399_v50 }
 0x110   :  { %v401_v53 = vpop.eup %400  ;;  %410 = vpow2.f32 %v362_v48 }
 0x111   :  { %412 = vrcp.f32 %v275_v52  ;;  %v276_v54 = vadd.f32 1.0, %v401_v53  ;;  %v403_v55 = vpop.eup %402 }
 0x112   :  { %414 = vtanh.f32 %v252_v51  ;;  %v405_v56 = vpop.eup %404  ;;  %v274_v60 = vadd.f32 1.0, %v403_v55 }
 0x113   :  { %416 = vrcp.f32 %v276_v54 }
 0x114   :  { %418 = vrcp.f32 %v274_v60 }
 0x11a   :  { %v407_v57 = vpop.eup %406 }
 0x11b   :  { %v296_v63 = vmul.f32 %v407_v57, %v405_v56 }
 0x11c   :  { %v409_v59 = vpop.eup %408 }
 0x11d   :  { %v411_v61 = vpop.eup %410  ;;  %v294_v62 = vmul.f32 %v409_v59, %v292_v58 }
 0x11e   :  { %v413_v0 = vpop.eup %412  ;;  %v277_v5 = vadd.f32 1.0, %v411_v61 }
 0x11f   :  { %v415_v2 = vpop.eup %414  ;;  %v298_v3 = vadd.f32 %v296_v63, %v294_v62 }
 0x120   :  { %v417_v4 = vpop.eup %416  ;;  %v297_v7 = vmul.f32 %v415_v2, %v413_v0 }
 0x121   :  { %420 = vtanh.f32 %v298_v3  ;;  %304 = vst [vmem:[#allocation9] sm:$0xff] %v298_v3  ;;  %v295_v6 = vmul.f32 %v417_v4, %v293_v1 }
 0x122   :  { %422 = vrcp.f32 %v277_v5 }
 0x123   :  { %v299_v8 = vadd.f32 %v297_v7, %v295_v6 }
 0x125   :  { %424 = vtanh.f32 %v299_v8  ;;  %305 = vst [vmem:[#allocation9 + $0x8] sm:$0xff] %v299_v8 }
 0x126   :  { %497 = shalt.err (!%p494_p5)
}
 0x127   :  { %331 = dma.vmem_to_hbm [thread:$0]  %s326_s13, 256, %s608_s5, [#allocation10], %s535_s21, %s535_s21, %s536_s22   ;;  %v419_v9 = vpop.eup %418 }
 0x128   :  { %s545_s17 = smov [#allocation8]  }
 0x129   :  { %s313_s18 = sshll.u32 %s545_s17, 4  ;;  %s314_s18 = int_to_ptr.vmem [resolvable:$true] %s313_s18 }
 0x12a   :  { %s506_s19 = scalar_lea.vmem %s314_s18, 256  ;;  %p511_p7 = scmp.lt.s32.totalorder %s314_s18, %s314_s18 }
 0x12b   :  { %p507_p6 = scmp.ne.s32.totalorder %s314_s18, %s506_s19  ;;  %p512_p8 = scmp.lt.s32.totalorder %s506_s19, %s506_s19 }
 0x12d   :  { %p513_p9 = por %p512_p8, %p511_p7 }
 0x12e   :  { %v421_v10 = vpop.eup %420 }
 0x12f   :  { %v302_v11 = vmul.f32 %v421_v10, %v419_v9  ;;  %v423_v12 = vpop.eup %422  ;;  %p514_p10 = pnand %p513_p9, %p507_p6 }
 0x131   :  { %306 = vst [vmem:[#allocation8] sm:$0xff] %v302_v11 }
 0x132   :  { %v425_v13 = vpop.eup %424 }
 0x133   :  { %v303_v14 = vmul.f32 %v425_v13, %v423_v12 }
 0x135   :  { %307 = vst [vmem:[#allocation8 + $0x8] sm:$0xff] %v303_v14 }
 0x136   :  { %517 = shalt.err (!%p514_p10)
}
 0x137   :  { %319 = dma.vmem_to_hbm [thread:$0]  %s314_s18, 256, %s607_s4, [#allocation4], %s535_s21, %s535_s21, %s536_s22  }
 0x138   :  { %530 = dma.done.wait [#allocation4], 256  }
 0x139   :  { %531 = vsyncadd [#allocation4], 4294967040 }
 0x13a   :  { %532 = dma.done.wait [#allocation10], 256  }
 0x13b   :  { %533 = vsyncadd [#allocation10], 4294967040 }
 0x13c   :  { %338 = vsyncpa [#allocation3], 1 }
 0x13d   :  { %339 = vsyncpa [#allocation6], 1 }
 0x13e   :  { %340 = vsyncpa [#allocation4], 1 }
 0x13f   :  { %341 = vsyncpa [#allocation10], 1 }

</bundles_post_ra>
